<compile_context>
chip_gen: v7x
topology: tpu7x:2x2x1
jax: 0.10.0
libtpu: 0.0.40
codegen_flags: <defaults>
</compile_context>

<pallas_src>
import functools

import jax
import jax.numpy as jnp
from jax.experimental import pallas as pl
from jax.experimental.pallas import tpu as pltpu

EPS = 1e-6


def _make_gem_kernel(hw_total, thw, n_hw_chunks, needs_mask):
    """Build the kernel body; all branch decisions are trace-time static."""
    inv_hw = 1.0 / float(hw_total)

    def kernel(p_ref, x_ref, o_ref, m_sc, l_sc):
        # p_ref : (1,) f32 in SMEM      (learnable scalar parameter)
        # x_ref : (TM, THW) in VMEM     (tile of (batch*channel, spatial))
        # o_ref : (TM, 1)   in VMEM
        # m_sc, l_sc : (TM, 1) f32 VMEM scratch (only used when the spatial
        #              axis is chunked: running max / rescaled running sum).
        p = p_ref[0]
        inv_p = 1.0 / p      # one scalar reciprocal per grid step
        # TODO(synk): p -> 0 / p < 0 are outside the module's intended range;
        # behavior there matches the (equally undefined) PyTorch reference.

        # Upcast to f32 for log/exp (safe on v5e; bf16 elementwise math on
        # v6e/v7x is a further optional win for bf16-fed inputs).
        x = jnp.maximum(x_ref[...].astype(jnp.float32), EPS)   # clamp(min=eps)
        if needs_mask:
            j = pl.program_id(1)
            lane = jax.lax.broadcasted_iota(jnp.int32, x.shape, dimension=1)
            valid = (j * thw + lane) < hw_total
            x = jnp.where(valid, x, EPS)   # pad lanes -> eps (kills garbage/NaN)

        # Row max is taken on x directly (max is monotone under log), so no
        # block-sized logx temporary is materialized before the reduction.
        x_max = jnp.max(x, axis=-1, keepdims=True)        # XLU reduce, (TM, 1)
        s_max = p * jnp.log(x_max)                        # (TM, 1) log only

        if n_hw_chunks == 1:
            # Single spatial chunk: direct max-stabilized generalized mean.
            #   mean(x^p) = exp(s_max) * mean(exp(p*log x - s_max))
            #   y = exp((s_max + log(mean(...))) / p);  exp args stay <= 0.
            xp = jnp.exp(p * jnp.log(x) - s_max)          # one fused elementwise pass
            m = jnp.sum(xp, axis=-1, keepdims=True) * inv_hw
            o_ref[...] = jnp.exp(inv_p * (s_max + jnp.log(m))).astype(o_ref.dtype)
        else:
            # Online (flash-style) rescaled accumulation across spatial chunks.
            j = pl.program_id(1)

            @pl.when(j == 0)
            def _():
                m_sc[...] = jnp.full_like(m_sc, -jnp.inf)
                l_sc[...] = jnp.zeros_like(l_sc)

            m_new = jnp.maximum(m_sc[...], s_max)
            corr = jnp.exp(m_sc[...] - m_new)             # (TM, 1)
            xp = jnp.exp(p * jnp.log(x) - m_new)
            if needs_mask:
                xp = jnp.where(valid, xp, 0.0)            # pad lanes contribute 0
            l_sc[...] = corr * l_sc[...] + jnp.sum(xp, axis=-1, keepdims=True)
            m_sc[...] = m_new

            @pl.when(j == pl.num_programs(1) - 1)
            def _():
                mean = l_sc[...] * inv_hw
                o_ref[...] = jnp.exp(
                    inv_p * (m_sc[...] + jnp.log(mean))).astype(o_ref.dtype)

    return kernel


@functools.lru_cache(maxsize=1)
def _vmem_budget():
    """(per-input-block byte budget, scoped vmem_limit_bytes) by TPU generation."""
    try:
        kind = jax.devices()[0].device_kind.lower()
    except Exception:
        kind = ""
    if ("v4" in kind) or ("v5" in kind) or ("v6" in kind):
        return 12 << 20, 96 << 20      # 128 MiB physical VMEM: big steps
    if ("v7" in kind) or ("7x" in kind):
        return 6 << 20, 56 << 20       # v7x: 64 MiB per TensorCore
    return 4 << 20, 48 << 20           # unknown generation: known-good conservative


def _round_up(n, m):
    return ((n + m - 1) // m) * m


def _choose_tiles(rows, hw, itemsize, block_budget):
    """Pick (tm, thw): rows per block and spatial chunk size (lanes)."""
    bpe = max(int(itemsize), 4)        # budget counts the f32 working set / element
    if 8 * hw * bpe <= block_budget:
        thw = hw                       # full spatial extent per block
        tm = max(8, (block_budget // (hw * bpe)) // 8 * 8)
        if tm >= rows:
            if rows >= 16 and rows * hw * bpe >= (1 << 20):
                # Keep >= 2 grid steps so the "parallel" axis can shard across
                # v7x's two TensorCores (negligible cost on v5e/v6e).
                tm = _round_up(pl.cdiv(rows, 2), 8)
            else:
                tm = rows              # single full-extent block
    else:
        # Huge feature map: chunk the spatial axis (multiple of 128 lanes).
        tm = rows if rows < 8 else 8
        thw = max(128, (block_budget // (8 * bpe)) // 128 * 128)
    return tm, thw


def _gem_impl(x, p, block_budget, vmem_limit):
    B, C, H, W = x.shape
    rows, hw = B * C, H * W
    x2 = x.reshape(rows, hw)           # bf16 inputs also supported (upcast in-kernel)
    p1 = jnp.asarray(p, jnp.float32).reshape(1)

    tm, thw = _choose_tiles(rows, hw, x2.dtype.itemsize, block_budget)
    n_row_tiles = pl.cdiv(rows, tm)
    n_hw_chunks = pl.cdiv(hw, thw)
    needs_mask = (hw % thw) != 0

    kernel = _make_gem_kernel(hw, thw, n_hw_chunks, needs_mask)

    cost = pl.CostEstimate(
        flops=6 * rows * hw,
        transcendentals=2 * rows * hw,                      # log + exp per element
        bytes_accessed=rows * hw * x2.dtype.itemsize + rows * x.dtype.itemsize,
    )

    out = pl.pallas_call(
        kernel,
        out_shape=jax.ShapeDtypeStruct((rows, 1), x.dtype),
        grid=(n_row_tiles, n_hw_chunks),
        in_specs=[
            pl.BlockSpec(memory_space=pltpu.MemorySpace.SMEM),   # p (scalar, untiled)
            pl.BlockSpec((tm, thw), lambda i, j: (i, j)),        # x tile
        ],
        out_specs=pl.BlockSpec((tm, 1), lambda i, j: (i, 0)),    # resident across j
        scratch_shapes=[
            pltpu.VMEM((tm, 1), jnp.float32),    # running max (p*log x space)
            pltpu.VMEM((tm, 1), jnp.float32),    # running rescaled sum
        ],
        compiler_params=pltpu.CompilerParams(
            dimension_semantics=("parallel", "arbitrary"),
            vmem_limit_bytes=vmem_limit,
        ),
        cost_estimate=cost,
    )(p1, x2)
    return out.reshape(B, C, 1, 1)


@jax.jit
def gem(x, p):
    """GeM forward: x (B, C, H, W), scalar p -> (B, C, 1, 1)."""
    block_budget, vmem_limit = _vmem_budget()
    return _gem_impl(x, p, block_budget, vmem_limit)


if __name__ == "__main__":
    key = jax.random.PRNGKey(0)

    # Deterministic "parameter": nn.Parameter(torch.ones(1) * 3) -> p = 3.0
    p = jnp.float32(3.0)

    def gem_ref(xx, pp):
        x_c = jnp.maximum(xx, EPS)
        return jnp.mean(x_c ** pp, axis=(-2, -1), keepdims=True) ** (1.0 / pp)

    # Small NCHW input consistent with the module's forward (single-chunk path).
    B, C, H, W = 2, 4, 16, 16
    x = jax.random.normal(key, (B, C, H, W), dtype=jnp.float32)
    y = gem(x, p)
    jax.block_until_ready(y)
    ref = gem_ref(x, p)
    assert y.shape == (B, C, 1, 1)
    assert jnp.allclose(y, ref, rtol=1e-4, atol=1e-6), float(jnp.max(jnp.abs(y - ref)))

    # Exercise the spatial-chunked (online reduction + masked tail) path with a
    # deliberately tiny per-block budget and non-128-multiple H*W.
    B2, C2, H2, W2 = 2, 8, 20, 20
    x_big = jax.random.normal(jax.random.PRNGKey(1), (B2, C2, H2, W2), jnp.float32)
    y2 = _gem_impl(x_big, p, block_budget=8 * 1024, vmem_limit=48 * 1024 * 1024)
    jax.block_until_ready(y2)
    ref2 = gem_ref(x_big, p)
    assert y2.shape == (B2, C2, 1, 1)
    assert jnp.allclose(y2, ref2, rtol=1e-4, atol=1e-6), float(jnp.max(jnp.abs(y2 - ref2)))

    print("KERNEL_OK")
</pallas_src>

<mosaic_0001>
module attributes {stable_mosaic.version = 11 : i64} {
  func.func @kernel(%arg0: i32, %arg1: i32, %arg2: memref<1xf32, #tpu.memory_space<smem>>, %arg3: memref<8x256xf32, #tpu.memory_space<vmem>>, %arg4: memref<8x1xf32, #tpu.memory_space<vmem>>, %arg5: memref<8x1xf32, #tpu.memory_space<vmem>>, %arg6: memref<8x1xf32, #tpu.memory_space<vmem>>) attributes {dimension_semantics = [#tpu.dimension_semantics<parallel>, #tpu.dimension_semantics<arbitrary>], iteration_bounds = array<i64: 1, 1>, scalar_prefetch = 0 : i64, scratch_operands = 2 : i64, tpu.core_type = #tpu.core_type<tc>, window_params = [{transform_indices = @transform_0, window_bounds = array<i64: 1>}, {transform_indices = @transform_1, window_bounds = array<i64: 8, 256>}, {transform_indices = @transform_2, window_bounds = array<i64: 8, 1>}]} {
    %c0 = arith.constant 0 : index
    %0 = memref.load %arg2[%c0] : memref<1xf32, #tpu.memory_space<smem>>
    %cst = arith.constant 1.000000e+00 : f32
    %1 = arith.divf %cst, %0 : f32
    %c0_0 = arith.constant 0 : index
    %c0_1 = arith.constant 0 : index
    %2 = vector.load %arg3[%c0_0, %c0_1] : memref<8x256xf32, #tpu.memory_space<vmem>>, vector<8x256xf32>
    %cst_2 = arith.constant 9.99999997E-7 : f32
    %3 = vector.broadcast %cst_2 : f32 to vector<8x256xf32>
    %4 = arith.maximumf %2, %3 : vector<8x256xf32>
    %cst_3 = arith.constant dense<0xFF800000> : vector<8xf32>
    %5 = vector.multi_reduction <maximumf>, %4, %cst_3 [1] : vector<8x256xf32> to vector<8xf32>
    %6 = vector.shape_cast %5 : vector<8xf32> to vector<8x1xf32>
    %7 = math.log %6 : vector<8x1xf32>
    %8 = vector.broadcast %0 : f32 to vector<8x1xf32>
    %9 = arith.mulf %8, %7 : vector<8x1xf32>
    %10 = math.log %4 : vector<8x256xf32>
    %11 = vector.broadcast %0 : f32 to vector<8x256xf32>
    %12 = arith.mulf %11, %10 : vector<8x256xf32>
    %13 = vector.broadcast %9 : vector<8x1xf32> to vector<8x256xf32>
    %14 = arith.subf %12, %13 : vector<8x256xf32>
    %15 = math.exp %14 : vector<8x256xf32>
    %cst_4 = arith.constant dense<0.000000e+00> : vector<8xf32>
    %16 = vector.multi_reduction <add>, %15, %cst_4 [1] : vector<8x256xf32> to vector<8xf32>
    %17 = vector.shape_cast %16 : vector<8xf32> to vector<8x1xf32>
    %cst_5 = arith.constant 3.906250e-03 : f32
    %18 = vector.broadcast %cst_5 : f32 to vector<8x1xf32>
    %19 = arith.mulf %17, %18 : vector<8x1xf32>
    %20 = math.log %19 : vector<8x1xf32>
    %21 = arith.addf %9, %20 : vector<8x1xf32>
    %22 = vector.broadcast %1 : f32 to vector<8x1xf32>
    %23 = arith.mulf %22, %21 : vector<8x1xf32>
    %24 = math.exp %23 : vector<8x1xf32>
    %c0_6 = arith.constant 0 : index
    %c0_7 = arith.constant 0 : index
    %25 = vector.load %arg4[%c0_6, %c0_7] : memref<8x1xf32, #tpu.memory_space<vmem>>, vector<8x1xf32>
    tpu.vector_store %arg4[%c0_6, %c0_7], %24 {strides = array<i32>} : memref<8x1xf32, #tpu.memory_space<vmem>>, vector<8x1xf32>,
    return
  }
  func.func @transform_0(%arg0: i32, %arg1: i32) -> i32 {
    %c0_i32 = arith.constant 0 : i32
    %c0_i32_0 = arith.constant 0 : i32
    return %c0_i32 : i32
  }
  func.func @transform_1(%arg0: i32, %arg1: i32) -> (i32, i32) {
    %c0_i32 = arith.constant 0 : i32
    return %arg0, %arg1 : i32, i32
  }
  func.func @transform_2(%arg0: i32, %arg1: i32) -> (i32, i32) {
    %c0_i32 = arith.constant 0 : i32
    %c0_i32_0 = arith.constant 0 : i32
    return %arg0, %c0_i32 : i32, i32
  }
}

</mosaic_0001>

<bundles_post_ra>
// kernel: gem.1
= control target key start
LH: loop header
LB: loop body
LE: loop exit
PB: predicated region body
PF: predicated region fallthrough
CT: control target
= control target key end

     0   :  { %vm50_vm0 = vcmask 7168   ;;  %s101_s1 = inlined_call_operand.vmem [shape: f32[8,256], index: 1, kind: input, shape index: {}]   ;;  %s102_s0 = inlined_call_operand.<no memory space> [shape: f32[1], index: 0, kind: input, shape index: {}]   ;;  %s103_s2 = inlined_call_operand.vmem [shape: f32[8,1], index: 2, kind: output, shape index: {}]  }
   0x1   :  { %v16_v0 = vld [vmem:[%s101_s1] sm:$0xff]  ;;  %v17_v1 = vld [vmem:[%s101_s1 + $0x8] sm:$0xff]  ;;  %v13_v5 = vstv %s102_s0 }
   0x2   :  { %v18_v2 = vmax.f32 %v16_v0, 1e-06  ;;  %v19_v3 = vmax.f32 %v17_v1, 1e-06  ;;  %58 = vrcp.f32 %v13_v5 }
   0x4   :  { %v20_v4 = vmax.f32 %v18_v2, %v19_v3  ;;  %60 = vlog2.f32 %v18_v2 }
   0x5   :  { %62 = vlog2.f32 %v19_v3 }
   0x6   :  { %21 = vmax.xlane.f32.xlu0 %v20_v4 }
   0xc   :  { %v59_v6 = vpop.eup %58 }
   0xd   :  { %56 = vpush %v59_v6 }
   0xe   :  { %v61_v8 = vpop.eup %60 }
   0xf   :  { %v63_v9 = vpop.eup %62  ;;  %v28_v10 = vmul.f32 0.6931472, %v61_v8 }
  0x10   :  { %v30_v11 = vmul.f32 0.6931472, %v63_v9 }
  0x11   :  { %v31_v13 = vmul.f32 %v28_v10, %v13_v5 }
  0x12   :  { %v32_v14 = vmul.f32 %v30_v11, %v13_v5 }
  0x3e   :  { %s57_s0 = spop %56 }
  0x3f   :  { %v46_v28 = vstv %s57_s0 }
  0x93   :  { %v22_v7 = vpop.xlane.xlu0 %21 }
  0x94   :  { %64 = vlog2.f32 %v22_v7 }
  0x9e   :  { %v65_v12 = vpop.eup %64 }
  0x9f   :  { %v24_v15 = vmul.f32 0.6931472, %v65_v12 }
  0xa1   :  { %v26_v16 = vmul.f32 %v24_v15, %v13_v5 }
  0xa3   :  { %v33_v17 = vsub.f32 %v31_v13, %v26_v16  ;;  %v34_v18 = vsub.f32 %v32_v14, %v26_v16 }
  0xa5   :  { %v35_v19 = vmul.f32 1.442695, %v33_v17  ;;  %v37_v20 = vmul.f32 1.442695, %v34_v18 }
  0xa7   :  { %66 = vpow2.f32 %v35_v19 }
  0xa8   :  { %68 = vpow2.f32 %v37_v20 }
  0xb1   :  { %v67_v21 = vpop.eup %66 }
  0xb2   :  { %v69_v22 = vpop.eup %68 }
  0xb3   :  { %v39_v23 = vadd.f32 %v69_v22, %v67_v21 }
  0xb5   :  { %40 = vadd.xlane.f32.xlu0 %v39_v23 }
 0x142   :  { %v41_v24 = vpop.xlane.xlu0 %40 }
 0x143   :  { %v42_v25 = vmul.f32 0.00390625, %v41_v24 }
 0x145   :  { %70 = vlog2.f32 %v42_v25 }
 0x14f   :  { %v71_v26 = vpop.eup %70 }
 0x150   :  { %v44_v27 = vmul.f32 0.6931472, %v71_v26 }
 0x152   :  { %v45_v29 = vadd.f32 %v44_v27, %v26_v16 }
 0x154   :  { %v47_v30 = vmul.f32 %v46_v28, %v45_v29 }
 0x156   :  { %v48_v31 = vmul.f32 1.442695, %v47_v30 }
 0x158   :  { %72 = vpow2.f32 %v48_v31 }
 0x162   :  { %v73_v32 = vpop.eup %72 }
 0x163   :  { %51 = vst.msk [vmem:[%s103_s2] sm:$0xff] %vm50_vm0, %v73_v32 }

</bundles_post_ra>
